<compile_context>
chip_gen: v7x
topology: tpu7x:2x2x1
jax: 0.10.0
libtpu: 0.0.40
codegen_flags: <defaults>
</compile_context>

<pallas_src>
import functools

import jax
import jax.numpy as jnp
from jax import lax
from jax.experimental import pallas as pl
from jax.experimental.pallas import tpu as pltpu

_LANES = 128  # TPU lane width (same on v5e / v6e / v7x)


def _angle_integral_kernel(x_ref, o_ref, *, reg_max):
    # x_ref: (TB, R, 128) -- bins on the sublane axis, anchors on the lane axis.
    # o_ref: (TB, 128)    -- lane-dense output (one expectation per anchor).
    r = reg_max + 1
    x = x_ref[...].astype(jnp.float32)

    # Numerically-stable softmax over the bin axis (axis=1, sublanes).
    m = jnp.max(x, axis=1, keepdims=True)            # (TB, 1, 128)
    e = jnp.exp(x - m)                               # (TB, R, 128)  (EUP)

    # project[i] = i / reg_max, built on-chip (no extra input stream).
    bins = lax.broadcasted_iota(jnp.int32, (r, _LANES), 0)
    proj = bins.astype(jnp.float32) * (1.0 / float(reg_max))   # (R, 128)

    # Fused normalization: expectation = sum(e * proj) / sum(e).
    w = jnp.sum(e * proj, axis=1)                    # (TB, 128) numerator
    s = jnp.sum(e, axis=1)                           # (TB, 128) denominator
    # Exact reciprocal (EUP slot; negligible volume). approx=True would add ~1e-3 rel err.
    o_ref[...] = (w * pl.reciprocal(s, approx=False)).astype(o_ref.dtype)


def angle_integral(x, reg_max=16, block_rows=512):
    """Integral of the bin distribution. Returns (N, 1) with N = x.size // (reg_max+1)."""
    r = reg_max + 1
    x2 = x.reshape(-1, r)
    n = x2.shape[0]

    # Group anchors in slabs of 128 (the lane width); bins go onto sublanes.
    g = pl.cdiv(n, _LANES)                 # number of 128-anchor slabs
    tb = max(1, min(block_rows, g))        # slabs per kernel block
    if tb < g:
        tb = max(8, (tb // 8) * 8)         # output block (tb, 128) needs tb % 8 == 0
    g_pad = pl.cdiv(g, tb) * tb
    rows_pad = g_pad * _LANES

    if rows_pad != n:
        # Small zero-pad; fuses with the relayout below (single extra copy pass total).
        x2 = jnp.pad(x2, ((0, rows_pad - n), (0, 0)))
    # One relayout pass: (N, R) row-major -> (G, R, 128) with anchors on lanes.
    xt = x2.reshape(g_pad, _LANES, r).transpose(0, 2, 1)

    # VMEM sizing: double-buffered input block (sublanes pad R -> ceil(R/8)*8) + output.
    r_pad = -(-r // 8) * 8
    vmem_needed = 2 * (tb * r_pad * _LANES * 4 + tb * _LANES * 4) + (8 << 20)
    vmem_limit = int(min(max(vmem_needed, 32 << 20), 64 << 20))

    kernel = functools.partial(_angle_integral_kernel, reg_max=reg_max)
    out = pl.pallas_call(
        kernel,
        out_shape=jax.ShapeDtypeStruct((g_pad, _LANES), x2.dtype),
        grid_spec=pltpu.PrefetchScalarGridSpec(
            num_scalar_prefetch=0,
            grid=(g_pad // tb,),
            in_specs=[pl.BlockSpec((tb, r, _LANES), lambda i: (i, 0, 0))],
            out_specs=pl.BlockSpec((tb, _LANES), lambda i: (i, 0)),
        ),
        compiler_params=pltpu.CompilerParams(
            dimension_semantics=("parallel",),   # megacore sharding on v7x
            vmem_limit_bytes=vmem_limit),
    )(xt)

    # Lane-dense (G, 128) slab back to the module's (N, 1) view (padded rows dropped).
    return out.reshape(-1, 1)[:n]


def angle_integral_ref(x, reg_max=16):
    r = reg_max + 1
    x2 = x.reshape(-1, r).astype(jnp.float32)
    p = jax.nn.softmax(x2, axis=1)
    proj = jnp.linspace(0.0, float(reg_max), r) / float(reg_max)
    return (p @ proj).reshape(-1, 1)


if __name__ == "__main__":
    reg_max = 16
    key0, key1 = jax.random.split(jax.random.PRNGKey(0), 2)

    # Regression-head logits: (batch=2, anchors=256, reg_max+1=17)
    x = jax.random.normal(key0, (2, 256, reg_max + 1), dtype=jnp.float32)
    out = jax.block_until_ready(angle_integral(x, reg_max=reg_max))
    ref = angle_integral_ref(x, reg_max=reg_max)
    assert out.shape == (2 * 256, 1), out.shape
    assert jnp.allclose(out.astype(jnp.float32), ref, atol=1e-5, rtol=1e-5), (
        float(jnp.max(jnp.abs(out.astype(jnp.float32) - ref))))

    # Ragged N (not a multiple of 128) + multi-step grid path.
    x2 = jax.random.normal(key1, (3, 1000, reg_max + 1), dtype=jnp.float32)
    out2 = jax.block_until_ready(angle_integral(x2, reg_max=reg_max, block_rows=8))
    ref2 = angle_integral_ref(x2, reg_max=reg_max)
    assert out2.shape == (3 * 1000, 1), out2.shape
    assert jnp.allclose(out2.astype(jnp.float32), ref2, atol=1e-5, rtol=1e-5), (
        float(jnp.max(jnp.abs(out2.astype(jnp.float32) - ref2))))

    print("KERNEL_OK")
</pallas_src>

<mosaic_0001>
module attributes {stable_mosaic.version = 11 : i64} {
  func.func @_angle_integral_kernel(%arg0: i32, %arg1: memref<4x17x128xf32, #tpu.memory_space<vmem>>, %arg2: memref<4x128xf32, #tpu.memory_space<vmem>>) attributes {dimension_semantics = [#tpu.dimension_semantics<parallel>], iteration_bounds = array<i64: 1>, scalar_prefetch = 0 : i64, scratch_operands = 0 : i64, tpu.core_type = #tpu.core_type<tc>, window_params = [{transform_indices = @transform_0, window_bounds = array<i64: 4, 17, 128>}, {transform_indices = @transform_1, window_bounds = array<i64: 4, 128>}]} {
    %c0 = arith.constant 0 : index
    %c0_0 = arith.constant 0 : index
    %c0_1 = arith.constant 0 : index
    %0 = vector.load %arg1[%c0, %c0_0, %c0_1] : memref<4x17x128xf32, #tpu.memory_space<vmem>>, vector<4x17x128xf32>
    %cst = arith.constant dense<0xFF800000> : vector<4x128xf32>
    %1 = vector.multi_reduction <maximumf>, %0, %cst [1] : vector<4x17x128xf32> to vector<4x128xf32>
    %2 = vector.shape_cast %1 : vector<4x128xf32> to vector<4x1x128xf32>
    %3 = vector.broadcast %2 : vector<4x1x128xf32> to vector<4x17x128xf32>
    %4 = arith.subf %0, %3 : vector<4x17x128xf32>
    %5 = math.exp %4 : vector<4x17x128xf32>
    %6 = tpu.iota {dimensions = array<i32: 0>} : vector<17x128xi32>
    %7 = arith.sitofp %6 : vector<17x128xi32> to vector<17x128xf32>
    %cst_2 = arith.constant 6.250000e-02 : f32
    %8 = vector.broadcast %cst_2 : f32 to vector<17x128xf32>
    %9 = arith.mulf %7, %8 : vector<17x128xf32>
    %10 = vector.shape_cast %9 : vector<17x128xf32> to vector<1x17x128xf32>
    %11 = vector.broadcast %10 : vector<1x17x128xf32> to vector<4x17x128xf32>
    %12 = arith.mulf %5, %11 : vector<4x17x128xf32>
    %cst_3 = arith.constant dense<0.000000e+00> : vector<4x128xf32>
    %13 = vector.multi_reduction <add>, %12, %cst_3 [1] : vector<4x17x128xf32> to vector<4x128xf32>
    %cst_4 = arith.constant dense<0.000000e+00> : vector<4x128xf32>
    %14 = vector.multi_reduction <add>, %5, %cst_4 [1] : vector<4x17x128xf32> to vector<4x128xf32>
    %15 = tpu.reciprocal %14 : vector<4x128xf32> -> vector<4x128xf32>
    %16 = arith.mulf %13, %15 : vector<4x128xf32>
    %c0_5 = arith.constant 0 : index
    %c0_6 = arith.constant 0 : index
    %17 = vector.load %arg2[%c0_5, %c0_6] : memref<4x128xf32, #tpu.memory_space<vmem>>, vector<4x128xf32>
    tpu.vector_store %arg2[%c0_5, %c0_6], %16 {strides = array<i32>} : memref<4x128xf32, #tpu.memory_space<vmem>>, vector<4x128xf32>,
    return
  }
  func.func @transform_0(%arg0: i32) -> (i32, i32, i32) {
    %c0_i32 = arith.constant 0 : i32
    %c0_i32_0 = arith.constant 0 : i32
    %c0_i32_1 = arith.constant 0 : i32
    return %arg0, %c0_i32, %c0_i32_0 : i32, i32, i32
  }
  func.func @transform_1(%arg0: i32) -> (i32, i32) {
    %c0_i32 = arith.constant 0 : i32
    %c0_i32_0 = arith.constant 0 : i32
    return %arg0, %c0_i32 : i32, i32
  }
}

</mosaic_0001>

<bundles_post_ra>
// kernel: tpu_custom_call.1
= control target key start
LH: loop header
LB: loop body
LE: loop exit
PB: predicated region body
PF: predicated region fallthrough
CT: control target
= control target key end

     0   :  { %6 = vsyncpa [#allocation3], 0  ;;  %vm22_vm0 = vcmask 1040384   ;;  %v94_v38 = vlaneseq  ;;  %vm200_vm1 = vcmask 1041409   ;;  %vm202_vm2 = vcmask 1042434   ;;  %s374_s0 = inlined_call_operand.vmem [shape: f32[4,17,128], index: 0, kind: input, shape index: {}]   ;;  %s375_s1 = inlined_call_operand.hbm [shape: f32[4,128], index: 1, kind: output, shape index: {}]  }
   0x1   :  { %v9_v0 = vld [vmem:[%s374_s0] sm:$0xff]  ;;  %v10_v1 = vld [vmem:[%s374_s0 + $0x8] sm:$0xff]  ;;  %v11_v2 = vld [vmem:[%s374_s0 + $0x10] sm:$0x1]  ;;  %vm204_vm3 = vcmask 1043459  }
   0x2   :  { %v12_v3 = vld [vmem:[%s374_s0 + $0x18] sm:$0xff]  ;;  %v13_v4 = vld [vmem:[%s374_s0 + $0x20] sm:$0xff]  ;;  %v21_v5 = vmax.f32 %v9_v0, %v10_v1  ;;  %v14_v6 = vld [vmem:[%s374_s0 + $0x28] sm:$0x1]  ;;  %v23_v9 = vsel %vm22_vm0, %v11_v2, -inf  ;;  %v95_v47 = vshrl.u32 %v94_v38, 7 }
   0x3   :  { %v311_v7 = vld [vmem:[%s374_s0 + $0x30] sm:$0xff]  ;;  %v316_v8 = vld [vmem:[%s374_s0 + $0x38] sm:$0xff]  ;;  %v31_v10 = vmax.f32 %v12_v3, %v13_v4  ;;  %v322_v11 = vld [vmem:[%s374_s0 + $0x40] sm:$0x1]  ;;  %v32_v15 = vsel %vm22_vm0, %v14_v6, -inf }
   0x4   :  { %v327_v12 = vld [vmem:[%s374_s0 + $0x48] sm:$0xff]  ;;  %v332_v13 = vld [vmem:[%s374_s0 + $0x50] sm:$0xff]  ;;  %v24_v14 = vmax.f32 %v21_v5, %v23_v9  ;;  %v40_v16 = vmax.f32 %v311_v7, %v316_v8  ;;  %v340_v17 = vld [vmem:[%s374_s0 + $0x58] sm:$0x1]  ;;  %v41_v19 = vsel %vm22_vm0, %v322_v11, -inf  ;;  %v96_v61 = vadd.s32 8, %v95_v47 }
   0x5   :  { %v33_v18 = vmax.f32 %v31_v10, %v32_v15  ;;  %v49_v20 = vmax.f32 %v327_v12, %v332_v13  ;;  %v50_v23 = vsel %vm22_vm0, %v340_v17, -inf  ;;  %s279_s0 = smov [#allocation2]  }
   0x6   :  { %v25_v21 = vrot.slane %v24_v14, 4  ;;  %v42_v22 = vmax.f32 %v40_v16, %v41_v19  ;;  %v99_v10 = vcvt.s32.f32 %v96_v61  ;;  %s214_s30 = sshll.u32 %s279_s0, 4  ;;  %s215_s30 = int_to_ptr.vmem [resolvable:$true] %s214_s30 }
   0x7   :  { %v34_v24 = vrot.slane %v33_v18, 4  ;;  %v51_v25 = vmax.f32 %v49_v20, %v50_v23  ;;  %s255_s2 = scalar_lea.vmem %s215_s30, 64  ;;  %p260_p1 = scmp.lt.s32.totalorder %s215_s30, %s215_s30 }
   0x8   :  { %v26_v26 = vmax.f32 %v24_v14, %v25_v21  ;;  %v43_v27 = vrot.slane %v42_v22, 4  ;;  %p256_p0 = scmp.ne.s32.totalorder %s215_s30, %s255_s2  ;;  %p261_p2 = scmp.lt.s32.totalorder %s255_s2, %s255_s2 }
   0x9   :  { %v35_v28 = vmax.f32 %v33_v18, %v34_v24  ;;  %v52_v29 = vrot.slane %v51_v25, 4 }
   0xa   :  { %v27_v30 = vrot.slane %v26_v26, 2  ;;  %v44_v31 = vmax.f32 %v42_v22, %v43_v27  ;;  %p262_p3 = por %p261_p2, %p260_p1 }
   0xb   :  { %v36_v32 = vrot.slane %v35_v28, 2  ;;  %v53_v33 = vmax.f32 %v51_v25, %v52_v29 }
   0xc   :  { %v28_v34 = vmax.f32 %v26_v26, %v27_v30  ;;  %v45_v35 = vrot.slane %v44_v31, 2  ;;  %p263_p4 = pnand %p262_p3, %p256_p0 }
   0xd   :  { %v37_v36 = vmax.f32 %v35_v28, %v36_v32  ;;  %v54_v37 = vrot.slane %v53_v33, 2 }
   0xe   :  { %v29_v39 = vrot.slane %v28_v34, 1  ;;  %v46_v40 = vmax.f32 %v44_v31, %v45_v35 }
   0xf   :  { %v38_v41 = vrot.slane %v37_v36, 1  ;;  %v55_v42 = vmax.f32 %v53_v33, %v54_v37 }
  0x10   :  { %v30_v43 = vmax.f32 %v28_v34, %v29_v39  ;;  %v47_v44 = vrot.slane %v46_v40, 1 }
  0x11   :  { %v39_v45 = vmax.f32 %v37_v36, %v38_v41  ;;  %v56_v46 = vrot.slane %v55_v42, 1 }
  0x12   :  { %v48_v48 = vmax.f32 %v46_v40, %v47_v44  ;;  %v58_v49 = vsub.f32 %v9_v0, %v30_v43  ;;  %v59_v50 = vsub.f32 %v10_v1, %v30_v43  ;;  %v60_v51 = vsub.f32 %v11_v2, %v30_v43 }
  0x13   :  { %v57_v52 = vmax.f32 %v55_v42, %v56_v46  ;;  %v61_v53 = vsub.f32 %v12_v3, %v39_v45  ;;  %v62_v54 = vsub.f32 %v13_v4, %v39_v45  ;;  %v63_v55 = vsub.f32 %v14_v6, %v39_v45 }
  0x14   :  { %v64_v56 = vsub.f32 %v311_v7, %v48_v48  ;;  %v70_v57 = vmul.f32 1.442695, %v58_v49  ;;  %v65_v58 = vsub.f32 %v316_v8, %v48_v48  ;;  %v66_v59 = vsub.f32 %v322_v11, %v48_v48 }
  0x15   :  { %v72_v60 = vmul.f32 1.442695, %v59_v50  ;;  %v74_v62 = vmul.f32 1.442695, %v60_v51  ;;  %v76_v63 = vmul.f32 1.442695, %v61_v53  ;;  %v67_v0 = vsub.f32 %v327_v12, %v57_v52 }
  0x16   :  { %223 = vpow2.f32 %v70_v57  ;;  %v78_v5 = vmul.f32 1.442695, %v62_v54  ;;  %v80_v1 = vmul.f32 1.442695, %v63_v55  ;;  %v97_v2 = vadd.s32 16, %v95_v47 }
  0x17   :  { %225 = vpow2.f32 %v72_v60  ;;  %v68_v3 = vsub.f32 %v332_v13, %v57_v52  ;;  %v82_v4 = vmul.f32 1.442695, %v64_v56  ;;  %v69_v6 = vsub.f32 %v340_v17, %v57_v52 }
  0x18   :  { %227 = vpow2.f32 %v74_v62  ;;  %v84_v7 = vmul.f32 1.442695, %v65_v58  ;;  %v98_v8 = vcvt.s32.f32 %v95_v47  ;;  %v86_v9 = vmul.f32 1.442695, %v66_v59 }
  0x19   :  { %229 = vpow2.f32 %v76_v63  ;;  %v88_v11 = vmul.f32 1.442695, %v67_v0  ;;  %v100_v14 = vcvt.s32.f32 %v97_v2  ;;  %v90_v12 = vmul.f32 1.442695, %v68_v3 }
  0x1a   :  { %231 = vpow2.f32 %v78_v5  ;;  %v92_v15 = vmul.f32 1.442695, %v69_v6  ;;  %v101_v16 = vmul.f32 0.0625, %v98_v8  ;;  %v102_v13 = vmul.f32 0.0625, %v99_v10 }
  0x1b   :  { %233 = vpow2.f32 %v80_v1  ;;  %v103_v18 = vmul.f32 0.0625, %v100_v14 }
  0x1c   :  { %235 = vpow2.f32 %v82_v4 }
  0x1d   :  { %237 = vpow2.f32 %v84_v7 }
  0x1e   :  { %239 = vpow2.f32 %v86_v9 }
  0x1f   :  { %241 = vpow2.f32 %v88_v11 }
  0x20   :  { %v224_v19 = vpop.eup %223  ;;  %243 = vpow2.f32 %v90_v12 }
  0x21   :  { %v226_v17 = vpop.eup %225  ;;  %245 = vpow2.f32 %v92_v15  ;;  %v104_v20 = vmul.f32 %v224_v19, %v101_v16 }
  0x22   :  { %v228_v21 = vpop.eup %227  ;;  %v105_v22 = vmul.f32 %v226_v17, %v102_v13  ;;  %v152_v23 = vadd.f32 %v226_v17, %v224_v19 }
  0x23   :  { %v230_v24 = vpop.eup %229  ;;  %v106_v25 = vmul.f32 %v228_v21, %v103_v18  ;;  %v153_v26 = vsel %vm22_vm0, %v228_v21, 0.0 }
  0x24   :  { %v232_v27 = vpop.eup %231  ;;  %v107_v28 = vmul.f32 %v230_v24, %v101_v16  ;;  %v116_v29 = vadd.f32 %v105_v22, %v104_v20  ;;  %v154_v30 = vadd.f32 %v153_v26, %v152_v23 }
  0x25   :  { %v234_v31 = vpop.eup %233  ;;  %v108_v32 = vmul.f32 %v232_v27, %v102_v13  ;;  %v117_v33 = vsel %vm22_vm0, %v106_v25, 0.0  ;;  %v161_v34 = vadd.f32 %v232_v27, %v230_v24 }
  0x26   :  { %v236_v35 = vpop.eup %235  ;;  %v109_v36 = vmul.f32 %v234_v31, %v103_v18  ;;  %v155_v37 = vrot.slane %v154_v30, 4  ;;  %v162_v38 = vsel %vm22_vm0, %v234_v31, 0.0  ;;  %v118_v45 = vadd.f32 %v117_v33, %v116_v29 }
  0x27   :  { %v238_v39 = vpop.eup %237  ;;  %v110_v40 = vmul.f32 %v236_v35, %v101_v16  ;;  %v125_v41 = vadd.f32 %v108_v32, %v107_v28  ;;  %v163_v42 = vadd.f32 %v162_v38, %v161_v34 }
  0x28   :  { %v240_v43 = vpop.eup %239  ;;  %v111_v44 = vmul.f32 %v238_v39, %v102_v13  ;;  %v126_v46 = vsel %vm22_vm0, %v109_v36, 0.0  ;;  %v156_v47 = vadd.f32 %v155_v37, %v154_v30  ;;  %v170_v60 = vadd.f32 %v238_v39, %v236_v35 }
  0x29   :  { %v242_v48 = vpop.eup %241  ;;  %v112_v49 = vmul.f32 %v240_v43, %v103_v18  ;;  %v127_v50 = vadd.f32 %v126_v46, %v125_v41  ;;  %v164_v51 = vrot.slane %v163_v42, 4  ;;  %v119_v62 = vrot.slane %v118_v45, 4 }
  0x2a   :  { %v244_v52 = vpop.eup %243  ;;  %v113_v53 = vmul.f32 %v242_v48, %v101_v16  ;;  %v134_v54 = vadd.f32 %v111_v44, %v110_v40  ;;  %v157_v55 = vrot.slane %v156_v47, 2  ;;  %v171_v3 = vsel %vm22_vm0, %v240_v43, 0.0 }
  0x2b   :  { %v246_v56 = vpop.eup %245  ;;  %v114_v57 = vmul.f32 %v244_v52, %v102_v13  ;;  %v135_v58 = vsel %vm22_vm0, %v112_v49, 0.0  ;;  %v165_v59 = vadd.f32 %v164_v51, %v163_v42  ;;  %v128_v0 = vrot.slane %v127_v50, 4 }
  0x2c   :  { %v115_v61 = vmul.f32 %v246_v56, %v103_v18  ;;  %v136_v63 = vadd.f32 %v135_v58, %v134_v54  ;;  %v158_v5 = vadd.f32 %v157_v55, %v156_v47  ;;  %v172_v8 = vadd.f32 %v171_v3, %v170_v60 }
  0x2d   :  { %v143_v1 = vadd.f32 %v114_v57, %v113_v53  ;;  %v166_v2 = vrot.slane %v165_v59, 2  ;;  %v120_v9 = vadd.f32 %v119_v62, %v118_v45  ;;  %v179_v11 = vadd.f32 %v244_v52, %v242_v48 }
  0x2e   :  { %v144_v4 = vsel %vm22_vm0, %v115_v61, 0.0  ;;  %v159_v6 = vrot.slane %v158_v5, 1  ;;  %v137_v10 = vrot.slane %v136_v63, 4  ;;  %v129_v14 = vadd.f32 %v128_v0, %v127_v50 }
  0x2f   :  { %v167_v7 = vadd.f32 %v166_v2, %v165_v59  ;;  %v145_v12 = vadd.f32 %v144_v4, %v143_v1  ;;  %v173_v16 = vrot.slane %v172_v8, 4  ;;  %v180_v13 = vsel %vm22_vm0, %v246_v56, 0.0 }
  0x30   :  { %v160_v18 = vadd.f32 %v159_v6, %v158_v5  ;;  %v138_v17 = vadd.f32 %v137_v10, %v136_v63  ;;  %v181_v21 = vadd.f32 %v180_v13, %v179_v11  ;;  %v121_v22 = vrot.slane %v120_v9, 2 }
  0x31   :  { %v168_v15 = vrot.slane %v167_v7, 1  ;;  %v174_v19 = vadd.f32 %v173_v16, %v172_v8  ;;  %v130_v23 = vrot.slane %v129_v14, 2  ;;  %v146_v24 = vrot.slane %v145_v12, 4 }
  0x32   :  { %v182_v26 = vrot.slane %v181_v21, 4  ;;  %247 = vrcp.f32 %v160_v18  ;;  %v139_v28 = vrot.slane %v138_v17, 2  ;;  %v122_v30 = vadd.f32 %v121_v22, %v120_v9 }
  0x33   :  { %v169_v20 = vadd.f32 %v168_v15, %v167_v7  ;;  %v175_v25 = vrot.slane %v174_v19, 2  ;;  %v131_v31 = vadd.f32 %v130_v23, %v129_v14  ;;  %v147_v32 = vadd.f32 %v146_v24, %v145_v12 }
  0x34   :  { %v183_v29 = vadd.f32 %v182_v26, %v181_v21  ;;  %v140_v36 = vadd.f32 %v139_v28, %v138_v17  ;;  %v123_v38 = vrot.slane %v122_v30, 1 }
  0x35   :  { %v176_v27 = vadd.f32 %v175_v25, %v174_v19  ;;  %249 = vrcp.f32 %v169_v20  ;;  %v132_v39 = vrot.slane %v131_v31, 1  ;;  %v148_v40 = vrot.slane %v147_v32, 2 }
  0x36   :  { %v184_v34 = vrot.slane %v183_v29, 2  ;;  %v141_v42 = vrot.slane %v140_v36, 1  ;;  %v124_v45 = vadd.f32 %v123_v38, %v122_v30 }
  0x37   :  { %v177_v33 = vrot.slane %v176_v27, 1  ;;  %v133_v46 = vadd.f32 %v132_v39, %v131_v31  ;;  %v149_v47 = vadd.f32 %v148_v40, %v147_v32 }
  0x38   :  { %v185_v37 = vadd.f32 %v184_v34, %v183_v29  ;;  %v142_v49 = vadd.f32 %v141_v42, %v140_v36 }
  0x39   :  { %v178_v35 = vadd.f32 %v177_v33, %v176_v27  ;;  %v150_v50 = vrot.slane %v149_v47, 1 }
  0x3a   :  { %v186_v41 = vrot.slane %v185_v37, 1 }
  0x3b   :  { %251 = vrcp.f32 %v178_v35  ;;  %v151_v55 = vadd.f32 %v150_v50, %v149_v47 }
  0x3c   :  { %v187_v43 = vadd.f32 %v186_v41, %v185_v37  ;;  %v248_v44 = vpop.eup %247 }
  0x3d   :  { %v192_v51 = vmul.f32 %v248_v44, %v124_v45 }
  0x3e   :  { %253 = vrcp.f32 %v187_v43 }
  0x3f   :  { %v250_v48 = vpop.eup %249 }
  0x40   :  { %v193_v52 = vmul.f32 %v250_v48, %v133_v46 }
  0x42   :  { %v201_v56 = vsel %vm200_vm1, %v193_v52, %v192_v51 }
  0x45   :  { %v252_v53 = vpop.eup %251 }
  0x46   :  { %v194_v54 = vmul.f32 %v252_v53, %v142_v49 }
  0x48   :  { %v254_v57 = vpop.eup %253  ;;  %v203_v58 = vsel %vm202_vm2, %v194_v54, %v201_v56 }
  0x49   :  { %v195_v59 = vmul.f32 %v254_v57, %v151_v55 }
  0x4b   :  { %v205_v60 = vsel %vm204_vm3, %v195_v59, %v203_v58 }
  0x4c   :  { %207 = vst [vmem:[#allocation2] sm:$0xf] %v205_v60 }
  0x4d   :  { %266 = shalt.err (!%p263_p4)
}
  0x4e   :  { %s267_s5 = scalar_lea.hbm %s375_s1, 64 }
  0x4f   :  { %p268_p5 = scmp.ne.s32.totalorder %s375_s1, %s267_s5  ;;  %p271_p6 = scmp.lt.u32.totalorder %s267_s5, %s375_s1 }
  0x51   :  { %p273_p7 = pnand %p271_p6, %p268_p5 }
  0x53   :  { %276 = shalt.err (!%p273_p7)
}
  0x54   :  { %217 = dma.vmem_to_hbm [thread:$0]  %s215_s30, 64, %s375_s1, [#allocation3]  }
  0x55   :  { %277 = dma.done.wait [#allocation3], 64  }
  0x56   :  { %278 = vsyncadd [#allocation3], 4294967232 }
  0x57   :  { %221 = vsyncpa [#allocation3], 1 }

</bundles_post_ra>
